<compile_context>
chip_gen: v7x
topology: tpu7x:2x2x1
jax: 0.10.0
libtpu: 0.0.40
codegen_flags: <defaults>
</compile_context>

<pallas_src>
import functools

import jax
import jax.numpy as jnp
from jax.experimental import pallas as pl
from jax.experimental.pallas import tpu as pltpu


# ~2 MiB per input buffer: big enough to sit near the HBM roofline
# (>= 1 MiB), small enough that double buffering fits comfortably inside
# v7x's 64 MiB VMEM (and trivially inside v5e/v6e's 128 MiB).
_TARGET_TILE_BYTES = 2 * 1024 * 1024


def _choose_tiles(num_rows, row_len, itemsize, target_bytes):
    """Pick (row_tile, lane_tile) for a (num_rows, row_len) row reduction."""
    min_rows = 8  # f32 sublane granularity
    if min_rows * row_len * itemsize <= target_bytes:
        # Whole H*W row fits: single spatial chunk, as many rows as fit.
        lane_tile = row_len
        row_tile = target_bytes // max(1, row_len * itemsize)
        row_tile = max(min_rows, (row_tile // min_rows) * min_rows)
    else:
        # Huge H*W: chunk the lane axis in multiples of 128 and accumulate
        # over a trailing "arbitrary" grid axis.
        lane_tile = (target_bytes // (min_rows * itemsize)) // 128 * 128
        lane_tile = max(128, lane_tile)
        row_tile = min_rows
    # Full-extent dims need no (8, 128) alignment; clamp to the array.
    row_tile = min(row_tile, num_rows)
    lane_tile = min(lane_tile, row_len)
    return row_tile, lane_tile


def _gap_kernel(x_ref, o_ref, *, inv_hw):
    """Single-pass kernel: the whole H*W row is one lane-dense tile."""
    x = x_ref[...].astype(jnp.float32)            # (row_tile, H*W), H*W on lanes
    row_sum = jnp.sum(x, axis=-1)                 # (row_tile,)
    # Lane-dense store: one (1, row_tile) block, no masked (1,1) stores.
    o_ref[...] = (row_sum * inv_hw)[None, :].astype(o_ref.dtype)


def _gap_kernel_chunked(x_ref, o_ref, acc_ref, *, inv_hw, hw, lane_tile,
                        mask_tail):
    """Spatially-chunked kernel: accumulate partial sums over grid axis 1."""
    k = pl.program_id(1)

    @pl.when(k == 0)
    def _init():
        acc_ref[...] = jnp.zeros_like(acc_ref)

    x = x_ref[...].astype(jnp.float32)            # (row_tile, lane_tile)
    if mask_tail:
        # Zero out the out-of-bounds lanes of the last (partial) chunk so the
        # running sum stays exact.
        lane = jax.lax.broadcasted_iota(jnp.int32, x.shape, dimension=1)
        valid = hw - k * lane_tile
        x = jnp.where(lane < valid, x, 0.0)
    acc_ref[...] += jnp.sum(x, axis=-1)[None, :]  # (1, row_tile) f32

    @pl.when(k == pl.num_programs(1) - 1)
    def _finalize():
        # Divide by H*W exactly once, at the end.
        o_ref[...] = (acc_ref[...] * inv_hw).astype(o_ref.dtype)


def global_avg_pool2d(x, *, target_tile_bytes=_TARGET_TILE_BYTES):
    """Global average pooling over spatial dims for NCHW input."""
    n, c, h, w = x.shape
    rows, hw = n * c, h * w
    xf = x.reshape(rows, hw)                      # free reshape for NCHW
    itemsize = jnp.dtype(x.dtype).itemsize
    tm, tl = _choose_tiles(rows, hw, itemsize, target_tile_bytes)
    nb = pl.cdiv(rows, tm)
    inv_hw = 1.0 / float(hw)

    out_shape = jax.ShapeDtypeStruct((nb, tm), x.dtype)

    if tl == hw:
        pooled = pl.pallas_call(
            functools.partial(_gap_kernel, inv_hw=inv_hw),
            out_shape=out_shape,
            grid_spec=pltpu.PrefetchScalarGridSpec(
                num_scalar_prefetch=0,
                grid=(nb,),
                in_specs=[pl.BlockSpec((tm, hw), lambda i: (i, 0))],
                out_specs=pl.BlockSpec((1, tm), lambda i: (i, 0)),
            ),
            compiler_params=pltpu.CompilerParams(
                dimension_semantics=("parallel",)),
        )(xf)
    else:
        nk = pl.cdiv(hw, tl)
        pooled = pl.pallas_call(
            functools.partial(_gap_kernel_chunked, inv_hw=inv_hw, hw=hw,
                              lane_tile=tl, mask_tail=(hw % tl != 0)),
            out_shape=out_shape,
            grid_spec=pltpu.PrefetchScalarGridSpec(
                num_scalar_prefetch=0,
                grid=(nb, nk),
                in_specs=[pl.BlockSpec((tm, tl), lambda i, k: (i, k))],
                out_specs=pl.BlockSpec((1, tm), lambda i, k: (i, 0)),
                scratch_shapes=[pltpu.VMEM((1, tm), jnp.float32)],
            ),
            compiler_params=pltpu.CompilerParams(
                dimension_semantics=("parallel", "arbitrary")),
        )(xf)

    # Drop any row padding from the last (partial) row block, restore NCHW.
    return pooled.reshape(nb * tm)[:rows].reshape(n, c, 1, 1)


if __name__ == "__main__":
    key = jax.random.PRNGKey(0)
    k1, k2 = jax.random.split(key)

    # Small NCHW input consistent with the module's forward (single-pass path).
    x1 = jax.random.normal(k1, (2, 4, 16, 16), dtype=jnp.float32)
    out1 = jax.block_until_ready(global_avg_pool2d(x1))
    ref1 = jnp.mean(x1, axis=(2, 3), keepdims=True)
    assert out1.shape == (2, 4, 1, 1), out1.shape
    assert jnp.allclose(out1, ref1, atol=1e-5, rtol=1e-5), "mismatch (path A)"

    # Small input with a tiny tile budget to exercise the spatially-chunked
    # accumulation path (init / accumulate / finalize + tail masking).
    x2 = jax.random.normal(k2, (2, 8, 48, 48), dtype=jnp.float32)
    out2 = jax.block_until_ready(
        global_avg_pool2d(x2, target_tile_bytes=64 * 1024))
    ref2 = jnp.mean(x2, axis=(2, 3), keepdims=True)
    assert out2.shape == (2, 8, 1, 1), out2.shape
    assert jnp.allclose(out2, ref2, atol=1e-5, rtol=1e-5), "mismatch (path B)"

    print("KERNEL_OK")
</pallas_src>

<mosaic_0001>
module attributes {stable_mosaic.version = 11 : i64} {
  func.func @_gap_kernel(%arg0: i32, %arg1: memref<8x256xf32, #tpu.memory_space<vmem>>, %arg2: memref<1x8xf32, #tpu.memory_space<vmem>>) attributes {dimension_semantics = [#tpu.dimension_semantics<parallel>], iteration_bounds = array<i64: 1>, scalar_prefetch = 0 : i64, scratch_operands = 0 : i64, tpu.core_type = #tpu.core_type<tc>, window_params = [{transform_indices = @transform_0, window_bounds = array<i64: 8, 256>}, {transform_indices = @transform_1, window_bounds = array<i64: 1, 8>}]} {
    %c0 = arith.constant 0 : index
    %c0_0 = arith.constant 0 : index
    %0 = vector.load %arg1[%c0, %c0_0] : memref<8x256xf32, #tpu.memory_space<vmem>>, vector<8x256xf32>
    %cst = arith.constant dense<0.000000e+00> : vector<8xf32>
    %1 = vector.multi_reduction <add>, %0, %cst [1] : vector<8x256xf32> to vector<8xf32>
    %cst_1 = arith.constant 3.906250e-03 : f32
    %2 = vector.broadcast %cst_1 : f32 to vector<8xf32>
    %3 = arith.mulf %1, %2 : vector<8xf32>
    %4 = vector.shape_cast %3 : vector<8xf32> to vector<1x8xf32>
    %c0_2 = arith.constant 0 : index
    %c0_3 = arith.constant 0 : index
    %5 = vector.load %arg2[%c0_2, %c0_3] : memref<1x8xf32, #tpu.memory_space<vmem>>, vector<1x8xf32>
    tpu.vector_store %arg2[%c0_2, %c0_3], %4 {strides = array<i32>} : memref<1x8xf32, #tpu.memory_space<vmem>>, vector<1x8xf32>,
    return
  }
  func.func @transform_0(%arg0: i32) -> (i32, i32) {
    %c0_i32 = arith.constant 0 : i32
    %c0_i32_0 = arith.constant 0 : i32
    return %arg0, %c0_i32 : i32, i32
  }
  func.func @transform_1(%arg0: i32) -> (i32, i32) {
    %c0_i32 = arith.constant 0 : i32
    %c0_i32_0 = arith.constant 0 : i32
    return %arg0, %c0_i32 : i32, i32
  }
}

</mosaic_0001>

<bundles_post_ra>
// kernel: tpu_custom_call.1
= control target key start
LH: loop header
LB: loop body
LE: loop exit
PB: predicated region body
PF: predicated region fallthrough
CT: control target
= control target key end

     0   :  { %6 = vsyncpa [#allocation3], 0  ;;  %s138_s0 = inlined_call_operand.hbm [shape: f32[8,256], index: 0, kind: input, shape index: {}]   ;;  %s139_s1 = inlined_call_operand.hbm [shape: f32[1,8], index: 1, kind: output, shape index: {}]  }
   0x1   :  { %7 = vsyncpa [#allocation4], 0  ;;  %s102_s6 = smov [#allocation2]   ;;  %s54_s10 = scalar_lea.hbm %s138_s0, 256 }
   0x2   :  { %s14_s7 = sshll.u32 %s102_s6, 4  ;;  %p55_p0 = scmp.ne.s32.totalorder %s138_s0, %s54_s10  ;;  %s15_s7 = int_to_ptr.vmem [resolvable:$true] %s14_s7 }
   0x3   :  { %p58_p1 = scmp.lt.u32.totalorder %s54_s10, %s138_s0 }
   0x5   :  { %p60_p2 = pnand %p58_p1, %p55_p0 }
   0x7   :  { %63 = shalt.err (!%p60_p2)
}
   0x8   :  { %s64_s15 = scalar_lea.vmem %s15_s7, 256  ;;  %p69_p4 = scmp.lt.s32.totalorder %s15_s7, %s15_s7 }
   0x9   :  { %p65_p3 = scmp.ne.s32.totalorder %s15_s7, %s64_s15  ;;  %p70_p5 = scmp.lt.s32.totalorder %s64_s15, %s64_s15 }
   0xb   :  { %p71_p6 = por %p70_p5, %p69_p4 }
   0xd   :  { %p72_p7 = pnand %p71_p6, %p65_p3 }
   0xf   :  { %75 = shalt.err (!%p72_p7)
}
  0x10   :  { %17 = dma.hbm_to_vmem [thread:$0]  %s138_s0, 256, %s15_s7, [#allocation3]  }
  0x11   :  { %98 = dma.done.wait [#allocation3], 256  }
  0x12   :  { %99 = vsyncadd [#allocation3], 4294967040  ;;  %v21_v0 = vld [vmem:[#allocation2] sm:$0xff]  ;;  %v22_v1 = vld [vmem:[#allocation2 + $0x8] sm:$0xff]  ;;  %v28_v3 = vlaneseq  ;;  %s103_s18 = smov [#allocation5]   ;;  %vm35_vm0 = vcmask 57344  }
  0x13   :  { %v23_v2 = vadd.f32 %v22_v1, %v21_v0  ;;  %s43_s19 = sshll.u32 %s103_s18, 4  ;;  %s44_s19 = int_to_ptr.vmem [resolvable:$true] %s43_s19 }
  0x14   :  { %v29_v4 = vand.u32 127, %v28_v3  ;;  %v31_v5 = vshrl.u32 %v28_v3, 7  ;;  %s76_s20 = scalar_lea.vmem %s44_s19, 16  ;;  %s80_s0 = scalar_lea.vmem %s44_s19, 32 }
  0x15   :  { %24 = vadd.xlane.f32.xlu0 %v23_v2  ;;  %p77_p8 = scmp.ne.s32.totalorder %s44_s19, %s76_s20  ;;  %p81_p9 = scmp.lt.s32.totalorder %s44_s19, %s44_s19 }
  0x16   :  { %v32_v6 = vsub.s32 %v29_v4, %v31_v5  ;;  %p82_p10 = scmp.lt.s32.totalorder %s80_s0, %s76_s20 }
  0x18   :  { %p83_p11 = por %p82_p10, %p81_p9 }
  0x1a   :  { %p84_p12 = pnand %p83_p11, %p77_p8 }
  0xa2   :  { %v25_v7 = vpop.xlane.xlu0 %24 }
  0xa3   :  { %v26_v8 = vmul.f32 0.00390625, %v25_v7 }
  0xa5   :  { %v33_v9 = vrot.slane %v26_v8, %v32_v6 }
  0xa7   :  { %36 = vst.msk [vmem:[#allocation5] sm:$0x1] %vm35_vm0, %v33_v9 }
  0xa8   :  { %87 = shalt.err (!%p84_p12)
}
  0xa9   :  { %s88_s23 = scalar_lea.hbm %s139_s1, 16 }
  0xaa   :  { %p89_p13 = scmp.ne.s32.totalorder %s139_s1, %s88_s23  ;;  %p92_p0 = scmp.lt.u32.totalorder %s88_s23, %s139_s1 }
  0xac   :  { %p94_p1 = pnand %p92_p0, %p89_p13 }
  0xae   :  { %97 = shalt.err (!%p94_p1)
}
  0xaf   :  { %46 = dma.vmem_to_hbm [thread:$0]  %s44_s19, 16, %s139_s1, [#allocation4]  }
  0xb0   :  { %100 = dma.done.wait [#allocation4], 16  }
  0xb1   :  { %101 = vsyncadd [#allocation4], 4294967280 }
  0xb2   :  { %50 = vsyncpa [#allocation3], 1 }
  0xb3   :  { %51 = vsyncpa [#allocation4], 1 }

</bundles_post_ra>
